<compile_context>
chip_gen: v7x
topology: tpu7x:2x2x1
jax: 0.10.0
libtpu: 0.0.40
codegen_flags: <defaults>
</compile_context>

<pallas_src>
import jax
import jax.numpy as jnp
from jax.experimental import pallas as pl
from jax.experimental.pallas import tpu as pltpu

_HIDDEN = 64        # logical hidden width (matches nn.Linear(., 64))
_H_PAD = 128        # lane-padded hidden width (full vreg lane width)
_LANE = 128         # TPU lane width
_MAX_TILE_B = 8192  # batch tile ceiling (lane-padded double-buffered in/out ~17 MiB)
_TARGET_STEPS = 4   # aim for >= 4 grid steps so v7x megacore can shard the batch


def _round_up(x, m):
    return ((x + m - 1) // m) * m


def _critic_kernel(x_ref, w1_ref, b1_ref, w2_ref, b2_ref, w3_ref, b3_ref, o_ref):
    # Whole MLP hot path: 3 MXU matmuls + 2 EUP tanh + VPU bias adds, straight-line.
    # No reductions over the batch tile, so stale rows in a ragged last block are
    # harmless (they are never written back to HBM).
    x = x_ref[...]
    h1 = jnp.tanh(
        jnp.dot(x, w1_ref[...], preferred_element_type=jnp.float32) + b1_ref[...]
    )
    h2 = jnp.tanh(
        jnp.dot(h1, w2_ref[...], preferred_element_type=jnp.float32) + b2_ref[...]
    )
    out = jnp.dot(h2, w3_ref[...], preferred_element_type=jnp.float32) + b3_ref[...]
    # Narrow (tile_b, 1) store: only column 0 carries the critic value.
    o_ref[...] = out[:, :1]


def pad_ppo_critic_params(params):
    """Zero-pad params once (hoisted out of the per-call wrapper).

    Padding is pure layout plumbing; tanh(0)=0 and zero weight columns keep the
    math exact.
    """
    w1, b1, w2, b2, w3, b3 = params
    D, H = w1.shape
    assert H == _HIDDEN
    w1p = jnp.zeros((D, _H_PAD), jnp.float32).at[:, :H].set(w1)
    b1p = jnp.zeros((1, _H_PAD), jnp.float32).at[:, :H].set(b1)
    w2p = jnp.zeros((_H_PAD, _H_PAD), jnp.float32).at[:H, :H].set(w2)
    b2p = jnp.zeros((1, _H_PAD), jnp.float32).at[:, :H].set(b2)
    # w3 kept 128 lanes wide (full-width MXU push); only column 0 is non-zero.
    w3p = jnp.zeros((_H_PAD, _LANE), jnp.float32).at[:H, :1].set(w3)
    b3p = jnp.zeros((1, _LANE), jnp.float32).at[:, :1].set(b3)
    return (w1p, b1p, w2p, b2p, w3p, b3p)


def ppo_critic_forward(states, padded_params):
    """states: (B, D) float32 -> (B, 1) float32, matching PPOCritic.forward."""
    w1p, b1p, w2p, b2p, w3p, b3p = padded_params
    B, D = states.shape
    H = _HIDDEN

    # Batch tile: multiple of 8, sized for >= _TARGET_STEPS grid steps (v7x
    # megacore sharding), capped so lane-padded double-buffered tiles fit VMEM.
    tile_b = max(8, min(_MAX_TILE_B, _round_up(pl.cdiv(B, _TARGET_STEPS), 8)))
    grid = (pl.cdiv(B, tile_b),)  # ragged last block handled by Pallas

    # Advisory cost for XLA scheduling (true HBM traffic now that output is narrow).
    cost = pl.CostEstimate(
        flops=2 * B * (D * H + H * H + H * 1),
        transcendentals=2 * B * H,
        bytes_accessed=4 * (B * D + B + D * H + H + H * H + H + H + 1),
    )

    # VMEM budget with lane-padded footprints:
    #   x tile:   (tile_b, D)  -> tile_b * 128 * 4 bytes in VMEM (lane padding)
    #   out tile: (tile_b, 1)  -> tile_b * 128 * 4 bytes in VMEM (lane padding)
    # both double-buffered, plus the (small) resident padded weights/biases.
    d_lanes = _round_up(D, _LANE)
    weight_bytes = 4 * (D * _H_PAD + _H_PAD * _H_PAD + _H_PAD * _LANE + 3 * 8 * _LANE)
    tile_bytes = 4 * 2 * tile_b * (d_lanes + _LANE) + 2 * weight_bytes
    vmem_limit = int(min(max(tile_bytes + (2 << 20), 8 << 20), 32 << 20))

    out = pl.pallas_call(
        _critic_kernel,
        out_shape=jax.ShapeDtypeStruct((B, 1), jnp.float32),
        grid=grid,
        in_specs=[
            pl.BlockSpec((tile_b, D), lambda i: (i, 0)),        # states: tiled over batch
            pl.BlockSpec((D, _H_PAD), lambda i: (0, 0)),        # w1: VMEM-resident
            pl.BlockSpec((1, _H_PAD), lambda i: (0, 0)),        # b1
            pl.BlockSpec((_H_PAD, _H_PAD), lambda i: (0, 0)),   # w2
            pl.BlockSpec((1, _H_PAD), lambda i: (0, 0)),        # b2
            pl.BlockSpec((_H_PAD, _LANE), lambda i: (0, 0)),    # w3 (col 0 real)
            pl.BlockSpec((1, _LANE), lambda i: (0, 0)),         # b3
        ],
        out_specs=pl.BlockSpec((tile_b, 1), lambda i: (i, 0)),  # narrow output
        compiler_params=pltpu.CompilerParams(
            dimension_semantics=("parallel",),  # rows independent -> 2-TC on v7x
            vmem_limit_bytes=vmem_limit,
        ),
        cost_estimate=cost,
    )(states, w1p, b1p, w2p, b2p, w3p, b3p)

    return out


def init_ppo_critic_params(key, state_dim, hidden=_HIDDEN):
    """Deterministic init mirroring nn.Linear default (U[-1/sqrt(fan_in), 1/sqrt(fan_in)])."""
    ks = jax.random.split(key, 6)

    def linear(kw, kb, fan_in, fan_out):
        bound = 1.0 / jnp.sqrt(jnp.float32(fan_in))
        w = jax.random.uniform(kw, (fan_in, fan_out), jnp.float32, -bound, bound)
        b = jax.random.uniform(kb, (1, fan_out), jnp.float32, -bound, bound)
        return w, b

    w1, b1 = linear(ks[0], ks[1], state_dim, hidden)
    w2, b2 = linear(ks[2], ks[3], hidden, hidden)
    w3, b3 = linear(ks[4], ks[5], hidden, 1)
    return (w1, b1, w2, b2, w3, b3)


def _reference(states, params):
    w1, b1, w2, b2, w3, b3 = params
    h1 = jnp.tanh(states @ w1 + b1)
    h2 = jnp.tanh(h1 @ w2 + b2)
    return h2 @ w3 + b3


if __name__ == "__main__":
    key = jax.random.PRNGKey(0)
    k_x, k_p = jax.random.split(key)

    batch, state_dim = 8, 16  # state_shape = (16,)
    states = jax.random.normal(k_x, (batch, state_dim), dtype=jnp.float32)
    params = init_ppo_critic_params(k_p, state_dim)
    padded_params = pad_ppo_critic_params(params)  # pad once, reuse every call

    out = jax.block_until_ready(ppo_critic_forward(states, padded_params))
    ref = _reference(states, params)
    assert out.shape == (batch, 1)
    assert jnp.allclose(out, ref, atol=1e-5, rtol=1e-5)

    # Multi-step grid with a ragged last block (B not a multiple of 8 or tile_b).
    big_b = 2048 + 37
    big_states = jax.random.normal(k_x, (big_b, state_dim), dtype=jnp.float32)
    big_out = jax.block_until_ready(ppo_critic_forward(big_states, padded_params))
    assert big_out.shape == (big_b, 1)
    assert jnp.allclose(big_out, _reference(big_states, params), atol=1e-5, rtol=1e-5)

    print("KERNEL_OK")
</pallas_src>

<mosaic_0001>
module attributes {stable_mosaic.version = 11 : i64} {
  func.func @_critic_kernel(%arg0: i32, %arg1: memref<8x16xf32, #tpu.memory_space<vmem>>, %arg2: memref<16x128xf32, #tpu.memory_space<vmem>>, %arg3: memref<1x128xf32, #tpu.memory_space<vmem>>, %arg4: memref<128x128xf32, #tpu.memory_space<vmem>>, %arg5: memref<1x128xf32, #tpu.memory_space<vmem>>, %arg6: memref<128x128xf32, #tpu.memory_space<vmem>>, %arg7: memref<1x128xf32, #tpu.memory_space<vmem>>, %arg8: memref<8x1xf32, #tpu.memory_space<vmem>>) attributes {dimension_semantics = [#tpu.dimension_semantics<parallel>], iteration_bounds = array<i64: 1>, scalar_prefetch = 0 : i64, scratch_operands = 0 : i64, tpu.core_type = #tpu.core_type<tc>, window_params = [{transform_indices = @transform_0, window_bounds = array<i64: 8, 16>}, {pipeline_mode = #tpu.pipeline_mode<synchronous>, transform_indices = @transform_1, window_bounds = array<i64: 16, 128>}, {pipeline_mode = #tpu.pipeline_mode<synchronous>, transform_indices = @transform_2, window_bounds = array<i64: 1, 128>}, {pipeline_mode = #tpu.pipeline_mode<synchronous>, transform_indices = @transform_3, window_bounds = array<i64: 128, 128>}, {pipeline_mode = #tpu.pipeline_mode<synchronous>, transform_indices = @transform_4, window_bounds = array<i64: 1, 128>}, {pipeline_mode = #tpu.pipeline_mode<synchronous>, transform_indices = @transform_5, window_bounds = array<i64: 128, 128>}, {pipeline_mode = #tpu.pipeline_mode<synchronous>, transform_indices = @transform_6, window_bounds = array<i64: 1, 128>}, {transform_indices = @transform_7, window_bounds = array<i64: 8, 1>}]} {
    %c0 = arith.constant 0 : index
    %c0_0 = arith.constant 0 : index
    %0 = vector.load %arg1[%c0, %c0_0] : memref<8x16xf32, #tpu.memory_space<vmem>>, vector<8x16xf32>
    %c0_1 = arith.constant 0 : index
    %c0_2 = arith.constant 0 : index
    %1 = vector.load %arg2[%c0_1, %c0_2] : memref<16x128xf32, #tpu.memory_space<vmem>>, vector<16x128xf32>
    %cst = arith.constant dense<0.000000e+00> : vector<8x128xf32>
    %2 = tpu.matmul %0, %1, %cst {dimension_numbers = #tpu.dot_dimension_numbers<[1], [0], [0], [1], [0, 0, 1, 1], [], []>} : vector<8x16xf32>, vector<16x128xf32>, vector<8x128xf32> -> vector<8x128xf32>
    %c0_3 = arith.constant 0 : index
    %c0_4 = arith.constant 0 : index
    %3 = vector.load %arg3[%c0_3, %c0_4] : memref<1x128xf32, #tpu.memory_space<vmem>>, vector<1x128xf32>
    %4 = vector.broadcast %3 : vector<1x128xf32> to vector<8x128xf32>
    %5 = arith.addf %2, %4 : vector<8x128xf32>
    %6 = math.tanh %5 : vector<8x128xf32>
    %c0_5 = arith.constant 0 : index
    %c0_6 = arith.constant 0 : index
    %7 = vector.load %arg4[%c0_5, %c0_6] : memref<128x128xf32, #tpu.memory_space<vmem>>, vector<128x128xf32>
    %cst_7 = arith.constant dense<0.000000e+00> : vector<8x128xf32>
    %8 = tpu.matmul %6, %7, %cst_7 {dimension_numbers = #tpu.dot_dimension_numbers<[1], [0], [0], [1], [0, 0, 1, 1], [], []>} : vector<8x128xf32>, vector<128x128xf32>, vector<8x128xf32> -> vector<8x128xf32>
    %c0_8 = arith.constant 0 : index
    %c0_9 = arith.constant 0 : index
    %9 = vector.load %arg5[%c0_8, %c0_9] : memref<1x128xf32, #tpu.memory_space<vmem>>, vector<1x128xf32>
    %10 = vector.broadcast %9 : vector<1x128xf32> to vector<8x128xf32>
    %11 = arith.addf %8, %10 : vector<8x128xf32>
    %12 = math.tanh %11 : vector<8x128xf32>
    %c0_10 = arith.constant 0 : index
    %c0_11 = arith.constant 0 : index
    %13 = vector.load %arg6[%c0_10, %c0_11] : memref<128x128xf32, #tpu.memory_space<vmem>>, vector<128x128xf32>
    %cst_12 = arith.constant dense<0.000000e+00> : vector<8x128xf32>
    %14 = tpu.matmul %12, %13, %cst_12 {dimension_numbers = #tpu.dot_dimension_numbers<[1], [0], [0], [1], [0, 0, 1, 1], [], []>} : vector<8x128xf32>, vector<128x128xf32>, vector<8x128xf32> -> vector<8x128xf32>
    %c0_13 = arith.constant 0 : index
    %c0_14 = arith.constant 0 : index
    %15 = vector.load %arg7[%c0_13, %c0_14] : memref<1x128xf32, #tpu.memory_space<vmem>>, vector<1x128xf32>
    %16 = vector.broadcast %15 : vector<1x128xf32> to vector<8x128xf32>
    %17 = arith.addf %14, %16 : vector<8x128xf32>
    %18 = vector.extract_strided_slice %17 {offsets = [0, 0], sizes = [8, 1], strides = [1, 1]} : vector<8x128xf32> to vector<8x1xf32>
    %c0_15 = arith.constant 0 : index
    %c0_16 = arith.constant 0 : index
    %19 = vector.load %arg8[%c0_15, %c0_16] : memref<8x1xf32, #tpu.memory_space<vmem>>, vector<8x1xf32>
    tpu.vector_store %arg8[%c0_15, %c0_16], %18 {strides = array<i32>} : memref<8x1xf32, #tpu.memory_space<vmem>>, vector<8x1xf32>,
    return
  }
  func.func @transform_0(%arg0: i32) -> (i32, i32) {
    %c0_i32 = arith.constant 0 : i32
    %c0_i32_0 = arith.constant 0 : i32
    return %arg0, %c0_i32 : i32, i32
  }
  func.func @transform_1(%arg0: i32) -> (i32, i32) {
    %c0_i32 = arith.constant 0 : i32
    %c0_i32_0 = arith.constant 0 : i32
    %c0_i32_1 = arith.constant 0 : i32
    return %c0_i32, %c0_i32_0 : i32, i32
  }
  func.func @transform_2(%arg0: i32) -> (i32, i32) {
    %c0_i32 = arith.constant 0 : i32
    %c0_i32_0 = arith.constant 0 : i32
    %c0_i32_1 = arith.constant 0 : i32
    return %c0_i32, %c0_i32_0 : i32, i32
  }
  func.func @transform_3(%arg0: i32) -> (i32, i32) {
    %c0_i32 = arith.constant 0 : i32
    %c0_i32_0 = arith.constant 0 : i32
    %c0_i32_1 = arith.constant 0 : i32
    return %c0_i32, %c0_i32_0 : i32, i32
  }
  func.func @transform_4(%arg0: i32) -> (i32, i32) {
    %c0_i32 = arith.constant 0 : i32
    %c0_i32_0 = arith.constant 0 : i32
    %c0_i32_1 = arith.constant 0 : i32
    return %c0_i32, %c0_i32_0 : i32, i32
  }
  func.func @transform_5(%arg0: i32) -> (i32, i32) {
    %c0_i32 = arith.constant 0 : i32
    %c0_i32_0 = arith.constant 0 : i32
    %c0_i32_1 = arith.constant 0 : i32
    return %c0_i32, %c0_i32_0 : i32, i32
  }
  func.func @transform_6(%arg0: i32) -> (i32, i32) {
    %c0_i32 = arith.constant 0 : i32
    %c0_i32_0 = arith.constant 0 : i32
    %c0_i32_1 = arith.constant 0 : i32
    return %c0_i32, %c0_i32_0 : i32, i32
  }
  func.func @transform_7(%arg0: i32) -> (i32, i32) {
    %c0_i32 = arith.constant 0 : i32
    %c0_i32_0 = arith.constant 0 : i32
    return %arg0, %c0_i32 : i32, i32
  }
}

</mosaic_0001>

<bundles_post_ra>
// kernel: tpu_custom_call.1
= control target key start
LH: loop header
LB: loop body
LE: loop exit
PB: predicated region body
PF: predicated region fallthrough
CT: control target
= control target key end

     0   :  { %12 = vsyncpa [#allocation3], 0  ;;  %s774_s0 = inlined_call_operand.hbm [shape: f32[8,16], index: 0, kind: input, shape index: {}]   ;;  %s775_s1 = inlined_call_operand.hbm [shape: f32[16,128], index: 1, kind: input, shape index: {}]   ;;  %s776_s2 = inlined_call_operand.vmem [shape: f32[1,128], index: 2, kind: input, shape index: {}]   ;;  %s777_s3 = inlined_call_operand.hbm [shape: f32[128,128], index: 3, kind: input, shape index: {}]   ;;  %s778_s4 = inlined_call_operand.vmem [shape: f32[1,128], index: 4, kind: input, shape index: {}]   ;;  %s779_s5 = inlined_call_operand.hbm [shape: f32[128,128], index: 5, kind: input, shape index: {}]   ;;  %s780_s6 = inlined_call_operand.vmem [shape: f32[1,128], index: 6, kind: input, shape index: {}]   ;;  %s781_s7 = inlined_call_operand.vmem [shape: f32[8,1], index: 7, kind: output, shape index: {}]  }
   0x1   :  { %13 = vsyncpa [#allocation5], 0 }
   0x2   :  { %14 = vsyncpa [#allocation8], 0  ;;  %s636_s24 = smov [#allocation4]   ;;  %s542_s28 = scalar_lea.hbm %s775_s1, 256 }
   0x3   :  { %s30_s25 = sshll.u32 %s636_s24, 4  ;;  %p543_p0 = scmp.ne.s32.totalorder %s775_s1, %s542_s28  ;;  %s31_s25 = int_to_ptr.vmem [resolvable:$true] %s30_s25 }
   0x4   :  { %p546_p1 = scmp.lt.u32.totalorder %s542_s28, %s775_s1 }
   0x6   :  { %p548_p2 = pnand %p546_p1, %p543_p0 }
   0x8   :  { %551 = shalt.err (!%p548_p2)
}
   0x9   :  { %s552_s10 = scalar_lea.vmem %s31_s25, 256  ;;  %p557_p4 = scmp.lt.s32.totalorder %s31_s25, %s31_s25 }
   0xa   :  { %p553_p3 = scmp.ne.s32.totalorder %s31_s25, %s552_s10  ;;  %p558_p5 = scmp.lt.s32.totalorder %s552_s10, %s552_s10 }
   0xc   :  { %p559_p6 = por %p558_p5, %p557_p4 }
   0xe   :  { %p560_p7 = pnand %p559_p6, %p553_p3 }
  0x10   :  { %563 = shalt.err (!%p560_p7)
}
  0x11   :  { %s637_s11 = smov 128   ;;  %s638_s12 = smov 8  }
  0x12   :  { %36 = dma.hbm_to_vmem [thread:$0]  %s775_s1, 256, %s31_s25, [#allocation5], %s637_s11, %s637_s11, %s638_s12  }
  0x13   :  { %s639_s15 = smov [#allocation2]   ;;  %s640_s17 = smov [#allocation6]  }
  0x14   :  { %s21_s16 = sshll.u32 %s639_s15, 4  ;;  %s44_s18 = sshll.u32 %s640_s17, 4  ;;  %s22_s16 = int_to_ptr.vmem [resolvable:$true] %s21_s16  ;;  %s45_s18 = int_to_ptr.vmem [resolvable:$true] %s44_s18 }
  0x15   :  { %s564_s21 = scalar_lea.hbm %s774_s0, 128 }
  0x16   :  { %p565_p8 = scmp.ne.s32.totalorder %s774_s0, %s564_s21  ;;  %p568_p9 = scmp.lt.u32.totalorder %s564_s21, %s774_s0 }
  0x18   :  { %p570_p10 = pnand %p568_p9, %p565_p8 }
  0x1a   :  { %573 = shalt.err (!%p570_p10)
}
  0x1b   :  { %s574_s1 = scalar_lea.vmem %s22_s16, 128  ;;  %p579_p12 = scmp.lt.s32.totalorder %s22_s16, %s22_s16 }
  0x1c   :  { %p575_p11 = scmp.ne.s32.totalorder %s22_s16, %s574_s1  ;;  %p580_p13 = scmp.lt.s32.totalorder %s574_s1, %s574_s1 }
  0x1e   :  { %p581_p0 = por %p580_p13, %p579_p12 }
  0x20   :  { %p582_p1 = pnand %p581_p0, %p575_p11 }
  0x22   :  { %585 = shalt.err (!%p582_p1)
}
  0x23   :  { %24 = dma.hbm_to_vmem [thread:$0]  %s774_s0, 128, %s22_s16, [#allocation3]  }
  0x24   :  { %s586_s30 = scalar_lea.hbm %s777_s3, 2048 }
  0x25   :  { %p587_p2 = scmp.ne.s32.totalorder %s777_s3, %s586_s30  ;;  %p590_p3 = scmp.lt.u32.totalorder %s586_s30, %s777_s3 }
  0x27   :  { %p592_p4 = pnand %p590_p3, %p587_p2 }
  0x29   :  { %595 = shalt.err (!%p592_p4)
}
  0x2a   :  { %s596_s14 = scalar_lea.vmem %s45_s18, 2048  ;;  %p601_p6 = scmp.lt.s32.totalorder %s45_s18, %s45_s18 }
  0x2b   :  { %p597_p5 = scmp.ne.s32.totalorder %s45_s18, %s596_s14  ;;  %p602_p7 = scmp.lt.s32.totalorder %s596_s14, %s596_s14 }
  0x2d   :  { %p603_p8 = por %p602_p7, %p601_p6 }
  0x2f   :  { %p604_p9 = pnand %p603_p8, %p597_p5 }
  0x31   :  { %607 = shalt.err (!%p604_p9)
}
  0x32   :  { %50 = dma.hbm_to_vmem [thread:$0]  %s777_s3, 2048, %s45_s18, [#allocation5], %s637_s11, %s637_s11, %s638_s12  }
  0x33   :  { %s641_s16 = smov [#allocation7]   ;;  %s608_s21 = scalar_lea.hbm %s779_s5, 2048 }
  0x34   :  { %s58_s17 = sshll.u32 %s641_s16, 4  ;;  %p609_p10 = scmp.ne.s32.totalorder %s779_s5, %s608_s21  ;;  %s59_s17 = int_to_ptr.vmem [resolvable:$true] %s58_s17 }
  0x35   :  { %p612_p11 = scmp.lt.u32.totalorder %s608_s21, %s779_s5 }
  0x37   :  { %p614_p12 = pnand %p612_p11, %p609_p10 }
  0x39   :  { %617 = shalt.err (!%p614_p12)
}
  0x3a   :  { %s618_s1 = scalar_lea.vmem %s59_s17, 2048  ;;  %p623_p0 = scmp.lt.s32.totalorder %s59_s17, %s59_s17 }
  0x3b   :  { %p619_p13 = scmp.ne.s32.totalorder %s59_s17, %s618_s1  ;;  %p624_p1 = scmp.lt.s32.totalorder %s618_s1, %s618_s1 }
  0x3d   :  { %p625_p2 = por %p624_p1, %p623_p0 }
  0x3f   :  { %p626_p3 = pnand %p625_p2, %p619_p13 }
  0x41   :  { %629 = shalt.err (!%p626_p3)
}
  0x42   :  { %64 = dma.hbm_to_vmem [thread:$0]  %s779_s5, 2048, %s59_s17, [#allocation8], %s637_s11, %s637_s11, %s638_s12  }
  0x43   :  { %630 = dma.done.wait [#allocation3], 128  }
  0x44   :  { %631 = vsyncadd [#allocation3], 4294967168 }
  0x45   :  { %632 = dma.done.wait [#allocation5], 2304  }
  0x46   :  { %633 = vsyncadd [#allocation5], 4294964992 }
  0x47   :  { %634 = dma.done.wait [#allocation8], 2048  }
  0x48   :  { %635 = vsyncadd [#allocation8], 4294965248  ;;  %v642_v0 = vmov 0.0|0.0   ;;  %vm643_vm0 = vmmov 0   ;;  %v644_v1 = vmov 0.0   ;;  %v80_v2 = vld [vmem:[#allocation4] sm:$0xff] }
  0x49   :  { %478 = vmatprep.subr.bf16.mxu0 %v642_v0  ;;  %405 = vmatprep.mubr.msk.f32.mxu0 %vm643_vm0, %v644_v1  ;;  %v81_v3 = vld [vmem:[#allocation4 + $0x8] sm:$0xff]  ;;  %v164_v5 = vld [vmem:[#allocation6] sm:$0xff]  ;;  %v165_v6 = vld [vmem:[#allocation6 + $0x8] sm:$0xff]  ;;  %vm89_vm1 = vcmask 130048   ;;  %vm351_vm2 = vcmask 7168  }
  0x4a   :  { %481 = vmatprep.subr.bf16.mxu1 %v642_v0  ;;  %440 = vmatprep.mubr.msk.f32.mxu1 %vm643_vm0, %v644_v1  ;;  %v479_v4 = vpack.c.bf16 %v81_v3, %v80_v2  ;;  %v166_v7 = vld [vmem:[#allocation6 + $0x10] sm:$0xff]  ;;  %v482_v8 = vpack.c.bf16 %v165_v6, %v164_v5  ;;  %v167_v9 = vld [vmem:[#allocation6 + $0x18] sm:$0xff]  ;;  %v79_v10 = vld [vmem:[#allocation2] sm:$0xff] }
  0x4b   :  { %v485_v11 = vpack.c.bf16 %v167_v9, %v166_v7  ;;  %v168_v12 = vld [vmem:[#allocation6 + $0x20] sm:$0xff]  ;;  %v169_v13 = vld [vmem:[#allocation6 + $0x28] sm:$0xff]  ;;  %v170_v15 = vld [vmem:[#allocation6 + $0x30] sm:$0xff] }
  0x4c   :  { %480 = vmatpush3.bf16.msra.mxu0 %v479_v4  ;;  %483 = vmatpush3.bf16.msra.mxu1 %v482_v8  ;;  %v488_v14 = vpack.c.bf16 %v169_v13, %v168_v12  ;;  %v171_v16 = vld [vmem:[#allocation6 + $0x38] sm:$0xff]  ;;  %v172_v18 = vld [vmem:[#allocation6 + $0x40] sm:$0xff]  ;;  %v173_v19 = vld [vmem:[#allocation6 + $0x48] sm:$0xff] }
  0x4d   :  { %505 = vmatprep.subr.bf16.mxu0 %v642_v0  ;;  %484 = vmatprep.subr.bf16.mxu1 %v642_v0  ;;  %v491_v17 = vpack.c.bf16 %v171_v16, %v170_v15  ;;  %v494_v20 = vpack.c.bf16 %v173_v19, %v172_v18  ;;  %v174_v21 = vld [vmem:[#allocation6 + $0x50] sm:$0xff]  ;;  %v175_v22 = vld [vmem:[#allocation6 + $0x58] sm:$0xff]  ;;  %v176_v24 = vld [vmem:[#allocation6 + $0x60] sm:$0xff] }
  0x4e   :  { %v497_v23 = vpack.c.bf16 %v175_v22, %v174_v21  ;;  %v177_v25 = vld [vmem:[#allocation6 + $0x68] sm:$0xff]  ;;  %v178_v27 = vld [vmem:[#allocation6 + $0x70] sm:$0xff]  ;;  %v179_v28 = vld [vmem:[#allocation6 + $0x78] sm:$0xff] }
  0x4f   :  { %406 = vmatmul.mubr.msk.f32.vlgmr.msra.gmra.mrb[0].mxu0 %vm89_vm1, %v79_v10  ;;  %v500_v26 = vpack.c.bf16 %v177_v25, %v176_v24  ;;  %v503_v29 = vpack.c.bf16 %v179_v28, %v178_v27  ;;  %v258_v30 = vld [vmem:[#allocation7] sm:$0xff]  ;;  %v259_v31 = vld [vmem:[#allocation7 + $0x8] sm:$0xff]  ;;  %v260_v32 = vld [vmem:[#allocation7 + $0x10] sm:$0xff] }
  0x50   :  { %475 = vmatprep.mubr.msk.f32.mxu0 %vm643_vm0, %v644_v1  ;;  %486 = vmatpush3.bf16.msra.mxu1 %v485_v11  ;;  %v506_v33 = vpack.c.bf16 %v259_v31, %v258_v30  ;;  %v261_v34 = vld [vmem:[#allocation7 + $0x18] sm:$0xff]  ;;  %v262_v36 = vld [vmem:[#allocation7 + $0x20] sm:$0xff]  ;;  %v263_v37 = vld [vmem:[#allocation7 + $0x28] sm:$0xff] }
  0x51   :  { %487 = vmatprep.subr.bf16.mxu1 %v642_v0  ;;  %v509_v35 = vpack.c.bf16 %v261_v34, %v260_v32  ;;  %v512_v38 = vpack.c.bf16 %v263_v37, %v262_v36  ;;  %v264_v39 = vld [vmem:[#allocation7 + $0x30] sm:$0xff]  ;;  %v265_v40 = vld [vmem:[#allocation7 + $0x38] sm:$0xff]  ;;  %v266_v42 = vld [vmem:[#allocation7 + $0x40] sm:$0xff] }
  0x52   :  { %507 = vmatpush3.bf16.msra.mxu0 %v506_v33  ;;  %v515_v41 = vpack.c.bf16 %v265_v40, %v264_v39  ;;  %v267_v43 = vld [vmem:[#allocation7 + $0x48] sm:$0xff]  ;;  %v268_v50 = vld [vmem:[#allocation7 + $0x50] sm:$0xff]  ;;  %v269_v51 = vld [vmem:[#allocation7 + $0x58] sm:$0xff] }
  0x53   :  { %508 = vmatprep.subr.bf16.mxu0 %v642_v0  ;;  %v518_v44 = vpack.c.bf16 %v267_v43, %v266_v42  ;;  %v360_v45 = vld [vmem:[%s776_s2] ss:$0 sm:$0xff]  ;;  %v521_v52 = vpack.c.bf16 %v269_v51, %v268_v50  ;;  %v270_v53 = vld [vmem:[#allocation7 + $0x60] sm:$0xff]  ;;  %v272_v56 = vld [vmem:[#allocation7 + $0x70] sm:$0xff] }
  0x54   :  { %489 = vmatpush3.bf16.msra.mxu1 %v488_v14  ;;  %v271_v54 = vld [vmem:[#allocation7 + $0x68] sm:$0xff]  ;;  %v273_v57 = vld [vmem:[#allocation7 + $0x78] sm:$0xff] }
  0x55   :  { %490 = vmatprep.subr.bf16.mxu1 %v642_v0  ;;  %v524_v55 = vpack.c.bf16 %v271_v54, %v270_v53  ;;  %v527_v58 = vpack.c.bf16 %v273_v57, %v272_v56  ;;  %v362_v59 = vld [vmem:[%s778_s4] ss:$0 sm:$0xff] }
  0x56   :  { %510 = vmatpush3.bf16.msra.mxu0 %v509_v35  ;;  %v363_v1 = vld [vmem:[%s780_s6] ss:$0 sm:$0xff] }
  0x57   :  { %511 = vmatprep.subr.bf16.mxu0 %v642_v0 }
  0x58   :  { %492 = vmatpush3.bf16.msra.mxu1 %v491_v17 }
  0x59   :  { %493 = vmatprep.subr.bf16.mxu1 %v642_v0 }
  0x5a   :  { %513 = vmatpush3.bf16.msra.mxu0 %v512_v38 }
  0x5b   :  { %514 = vmatprep.subr.bf16.mxu0 %v642_v0 }
  0x5c   :  { %495 = vmatpush3.bf16.msra.mxu1 %v494_v20 }
  0x5d   :  { %496 = vmatprep.subr.bf16.mxu1 %v642_v0 }
  0x5e   :  { %516 = vmatpush3.bf16.msra.mxu0 %v515_v41 }
  0x5f   :  { %517 = vmatprep.subr.bf16.mxu0 %v642_v0 }
  0x60   :  { %498 = vmatpush3.bf16.msra.mxu1 %v497_v23 }
  0x61   :  { %499 = vmatprep.subr.bf16.mxu1 %v642_v0 }
  0x62   :  { %519 = vmatpush3.bf16.msra.mxu0 %v518_v44 }
  0x63   :  { %520 = vmatprep.subr.bf16.mxu0 %v642_v0 }
  0x64   :  { %501 = vmatpush3.bf16.msra.mxu1 %v500_v26 }
  0x65   :  { %502 = vmatprep.subr.bf16.mxu1 %v642_v0 }
  0x66   :  { %522 = vmatpush3.bf16.msra.mxu0 %v521_v52 }
  0x67   :  { %523 = vmatprep.subr.bf16.mxu0 %v642_v0 }
  0x68   :  { %504 = vmatpush3.bf16.msra.mxu1 %v503_v29 }
  0x6a   :  { %525 = vmatpush3.bf16.msra.mxu0 %v524_v55 }
  0x6b   :  { %526 = vmatprep.subr.bf16.mxu0 %v642_v0 }
  0x6e   :  { %528 = vmatpush3.bf16.msra.mxu0 %v527_v58 }
 0x122   :  { %v159_v46 = vpop.f32.mrb[0].mxu0 }
 0x123   :  { %v160_v47 = vadd.f32 %v360_v45, %v159_v46  ;;  %v407_v48 = vpop.f32.mrb[1].mxu0 }
 0x125   :  { %538 = vtanh.f32 %v160_v47 }
 0x12f   :  { %v539_v49 = vpop.eup %538 }
 0x130   :  { %441 = vmatmul.mubr.f32.vlgmr.msra.gmra.mrb[0].mxu1 %v539_v49 }
 0x203   :  { %v253_v60 = vpop.f32.mrb[0].mxu1 }
 0x204   :  { %v254_v61 = vadd.f32 %v362_v59, %v253_v60  ;;  %v442_v62 = vpop.f32.mrb[1].mxu1 }
 0x206   :  { %540 = vtanh.f32 %v254_v61 }
 0x210   :  { %v541_v63 = vpop.eup %540 }
 0x211   :  { %476 = vmatmul.mubr.f32.vlgmr.msra.gmra.mrb[2].mxu0 %v541_v63 }
 0x2e4   :  { %v347_v2 = vpop.f32.mrb[2].mxu0 }
 0x2e5   :  { %v348_v3 = vadd.f32 %v363_v1, %v347_v2  ;;  %v477_v4 = vpop.f32.mrb[3].mxu0 }
 0x2e7   :  { %352 = vst.msk [vmem:[%s781_s7] sm:$0xff] %vm351_vm2, %v348_v3 }
 0x2e8   :  { %357 = vsyncpa [#allocation3], 1 }
 0x2e9   :  { %358 = vsyncpa [#allocation5], 1 }
 0x2ea   :  { %359 = vsyncpa [#allocation8], 1 }

</bundles_post_ra>
